<compile_context>
chip_gen: v6e
topology: v6e:2x2x1
jax: 0.10.0
libtpu: 0.0.40
codegen_flags: <defaults>
</compile_context>

<pallas_src>
import functools
import math

import jax
import jax.numpy as jnp
from jax.experimental import pallas as pl
from jax.experimental.pallas import tpu as pltpu


# ----------------------------------------------------------------------------
# Kernels
# ----------------------------------------------------------------------------
def _eq_conv_banded_kernel(x_ref, w_ref, b_ref, s_ref, o_ref, *, kh_size, oh, stride):
    """Small-channel path, one batch element per grid step.

    x_ref: (1, Hp, Wp*Cin)        lane-packed, zero-padded input
    w_ref: (KH, Wp*Cin, OW*Cout)  banded (Toeplitz over width) weights, unscaled
    b_ref: (1, OW*Cout)           bias tiled into the lane-dense output layout
    s_ref: (2,) in SMEM           [weight_mul, bias_mul]
    o_ref: (1, OH, OW*Cout)       lane-dense output slab (unmasked stores)
    """
    lanes = o_ref.shape[-1]
    xv = x_ref[0]                                    # (Hp, Wp*Cin), loaded once
    acc = jnp.zeros((oh, lanes), jnp.float32)
    for kh in range(kh_size):                        # KH matmuls, K = Wp*Cin
        if stride == 1:
            lhs = xv[kh:kh + oh, :]
        else:
            lhs = xv[kh:kh + (oh - 1) * stride + 1:stride, :]
        # native-dtype operands on the MXU, f32 accumulation
        acc = acc + jnp.dot(lhs, w_ref[kh], preferred_element_type=jnp.float32)
    # equalized-LR scales applied once, read from SMEM (no recompiles per scale)
    out = acc * s_ref[0] + b_ref[...].astype(jnp.float32) * s_ref[1]
    o_ref[0] = out.astype(o_ref.dtype)


def _eq_conv_taps_kernel(x_ref, w_ref, b_ref, s_ref, o_ref, *,
                         kh_size, kw_size, th, ow, stride):
    """General path (large channels / large maps), grid = (N, OH // TH).

    x_ref: (1, Hp, Wp, Cin)   full padded image (resident across row tiles)
    w_ref: (KH, KW, Cin, Cout) unscaled weights
    b_ref: (1, Cout)
    s_ref: (2,) in SMEM       [weight_mul, bias_mul]
    o_ref: (1, TH, OW, Cout)  row tile of the output
    """
    cin = x_ref.shape[-1]
    cout = o_ref.shape[-1]
    row0 = pl.program_id(1) * (th * stride)          # first input row of this tile
    acc = jnp.zeros((th * ow, cout), jnp.float32)
    for kh in range(kh_size):
        for kw in range(kw_size):
            if stride == 1:
                patch = x_ref[0, pl.ds(row0 + kh, th), pl.ds(kw, ow), :]
            else:
                patch = x_ref[0, pl.ds(row0 + kh, th, stride=stride),
                                 pl.ds(kw, ow, stride=stride), :]
            acc = acc + jnp.dot(patch.reshape(th * ow, cin), w_ref[kh, kw],
                                preferred_element_type=jnp.float32)
    out2d = acc * s_ref[0] + b_ref[...].astype(jnp.float32) * s_ref[1]
    o_ref[0] = out2d.reshape(th, ow, cout).astype(o_ref.dtype)


# ----------------------------------------------------------------------------
# Wrapper-side glue (pure JAX layout plumbing)
# ----------------------------------------------------------------------------
def _pick_row_tile(oh):
    # Output-row tile. The banded/taps output block uses TH on the second-minor
    # axis, so TH must be a multiple of 8 or equal to OH. Prefer >=2 row tiles
    # (keeps both v7x TensorCores busy even at batch 1) while staying large.
    if oh <= 8 or oh % 8 != 0:
        return oh
    cands = [t for t in range(8, oh, 8) if oh % t == 0]
    return max(cands) if cands else oh


def _maybe_vmem_limit(block_bytes):
    # Only override the default scoped-VMEM limit when the (double-buffered)
    # working set actually needs it; clamp to 64 MiB so the same code is safe
    # on v7x (64 MiB physical) as well as v5e/v6e (128 MiB).
    need = 2 * int(block_bytes) + (2 << 20)
    if need <= (16 << 20):
        return None
    return int(min(need, 64 << 20))


def _banded_weight(w_khwc, wp, ow, stride):
    """(KH, KW, Cin, Cout) -> banded (KH, Wp*Cin, OW*Cout) with
    banded[kh, (o*stride+kw)*Cin+ci, o*Cout+c] = w[kh, kw, ci, c], zero elsewhere."""
    kh_, kw_, cin, cout = w_khwc.shape
    o = jnp.arange(ow)
    kw = jnp.arange(kw_)
    ci = jnp.arange(cin)
    c = jnp.arange(cout)
    rows = (o[:, None, None] * stride + kw[None, :, None]) * cin + ci[None, None, :]
    cols = o[:, None] * cout + c[None, :]
    kh_idx = jnp.arange(kh_)[:, None, None, None, None]
    row_b = rows[None, :, :, :, None]
    col_b = cols[None, :, None, None, :]
    val = jnp.broadcast_to(w_khwc[:, None, :, :, :], (kh_, ow, kw_, cin, cout))
    banded = jnp.zeros((kh_, wp * cin, ow * cout), w_khwc.dtype)
    return banded.at[kh_idx, row_b, col_b].set(val)


def _conv2d_banded(x_pad, weight, bias, *, stride, oh, ow, weight_mul, bias_mul):
    n, hp, wp, cin = x_pad.shape
    cout, _, kh, kw = weight.shape
    lanes = ow * cout
    isz = x_pad.dtype.itemsize

    x_packed = x_pad.reshape(n, hp, wp * cin)                       # lane-packed input
    w_t = jnp.transpose(weight, (2, 3, 1, 0)).astype(x_pad.dtype)   # (KH,KW,Cin,Cout)
    w_banded = _banded_weight(w_t, wp, ow, stride)                  # (KH, Wp*Cin, OW*Cout)
    b_dense = jnp.tile(bias.astype(jnp.float32), ow).reshape(1, lanes)
    scales = jnp.array([weight_mul, bias_mul], jnp.float32)

    kernel = functools.partial(_eq_conv_banded_kernel, kh_size=kh, oh=oh, stride=stride)

    block_bytes = (hp * wp * cin * isz
                   + w_banded.size * w_banded.dtype.itemsize
                   + lanes * 4 + oh * lanes * isz)
    flops = 2 * n * oh * ow * kh * kw * cin * cout
    bytes_accessed = int(x_packed.size * isz
                         + w_banded.size * w_banded.dtype.itemsize
                         + n * oh * lanes * isz)

    out = pl.pallas_call(
        kernel,
        out_shape=jax.ShapeDtypeStruct((n, oh, lanes), x_pad.dtype),
        grid_spec=pltpu.PrefetchScalarGridSpec(
            num_scalar_prefetch=0,
            grid=(n,),
            in_specs=[
                pl.BlockSpec((1, hp, wp * cin), lambda i: (i, 0, 0)),
                pl.BlockSpec((kh, wp * cin, lanes), lambda i: (0, 0, 0)),
                pl.BlockSpec((1, lanes), lambda i: (0, 0)),
                pl.BlockSpec(memory_space=pltpu.MemorySpace.SMEM),
            ],
            out_specs=pl.BlockSpec((1, oh, lanes), lambda i: (i, 0, 0)),
        ),
        compiler_params=pltpu.CompilerParams(
            dimension_semantics=("parallel",),
            vmem_limit_bytes=_maybe_vmem_limit(block_bytes)),
        cost_estimate=pl.CostEstimate(flops=int(flops), transcendentals=0,
                                      bytes_accessed=bytes_accessed),
    )(x_packed, w_banded, b_dense, scales)
    return out.reshape(n, oh, ow, cout)                              # NHWC


def _conv2d_taps(x_pad, weight, bias, *, stride, oh, ow, weight_mul, bias_mul):
    n, hp, wp, cin = x_pad.shape
    cout, _, kh, kw = weight.shape
    th = _pick_row_tile(oh)
    n_rt = oh // th
    isz = x_pad.dtype.itemsize

    w_t = jnp.transpose(weight, (2, 3, 1, 0)).astype(x_pad.dtype)    # (KH,KW,Cin,Cout)
    b2 = bias.astype(jnp.float32).reshape(1, cout)
    scales = jnp.array([weight_mul, bias_mul], jnp.float32)

    kernel = functools.partial(_eq_conv_taps_kernel, kh_size=kh, kw_size=kw,
                               th=th, ow=ow, stride=stride)

    # TODO(synk): halo-tiled input blocks (pl.Element on H / manual DMA) so very
    # large feature maps do not need the full padded image resident in VMEM.
    block_bytes = (hp * wp * cin * isz + kh * kw * cin * cout * isz
                   + th * ow * cout * isz + cout * 4)
    flops = 2 * n * oh * ow * kh * kw * cin * cout
    bytes_accessed = int(n * hp * wp * cin * isz
                         + kh * kw * cin * cout * isz
                         + n * oh * ow * cout * isz)

    out = pl.pallas_call(
        kernel,
        out_shape=jax.ShapeDtypeStruct((n, oh, ow, cout), x_pad.dtype),
        grid_spec=pltpu.PrefetchScalarGridSpec(
            num_scalar_prefetch=0,
            grid=(n, n_rt),
            in_specs=[
                pl.BlockSpec((1, hp, wp, cin), lambda i, j: (i, 0, 0, 0)),
                pl.BlockSpec((kh, kw, cin, cout), lambda i, j: (0, 0, 0, 0)),
                pl.BlockSpec((1, cout), lambda i, j: (0, 0)),
                pl.BlockSpec(memory_space=pltpu.MemorySpace.SMEM),
            ],
            out_specs=pl.BlockSpec((1, th, ow, cout), lambda i, j: (i, j, 0, 0)),
        ),
        compiler_params=pltpu.CompilerParams(
            dimension_semantics=("parallel", "parallel"),
            vmem_limit_bytes=_maybe_vmem_limit(block_bytes)),
        cost_estimate=pl.CostEstimate(flops=int(flops), transcendentals=0,
                                      bytes_accessed=bytes_accessed),
    )(x_pad, w_t, b2, scales)
    return out                                                        # NHWC


def equalized_conv2d(x, weight, bias, *, stride=1, padding=0,
                     weight_mul=1.0, bias_mul=1.0):
    """x: (N, Cin, H, W)  weight: (Cout, Cin, KH, KW)  bias: (Cout,) -> (N, Cout, OH, OW)"""
    n, cin, h, w = x.shape
    cout, cin_w, kh, kw = weight.shape
    assert cin == cin_w

    # Glue: NCHW -> NHWC + spatial zero pad (same semantics as F.conv2d padding).
    x_nhwc = jnp.transpose(x, (0, 2, 3, 1))
    x_pad = jnp.pad(x_nhwc, ((0, 0), (padding, padding), (padding, padding), (0, 0)))
    hp, wp = h + 2 * padding, w + 2 * padding
    oh = (hp - kh) // stride + 1
    ow = (wp - kw) // stride + 1

    isz = x.dtype.itemsize
    banded_bytes = kh * (wp * cin) * (ow * cout) * isz
    img_bytes = hp * wp * cin * isz
    acc_bytes = oh * ow * cout * 4
    use_banded = (cout < 128 and banded_bytes <= (2 << 20)
                  and img_bytes <= (4 << 20) and acc_bytes <= (1 << 19))

    wm = float(weight_mul)
    bm = float(bias_mul)
    if use_banded:
        out_nhwc = _conv2d_banded(x_pad, weight, bias, stride=stride, oh=oh, ow=ow,
                                  weight_mul=wm, bias_mul=bm)
    else:
        out_nhwc = _conv2d_taps(x_pad, weight, bias, stride=stride, oh=oh, ow=ow,
                                weight_mul=wm, bias_mul=bm)
    # Glue: NHWC -> NCHW
    return jnp.transpose(out_nhwc, (0, 3, 1, 2))


def equalized_conv1d(x, weight, bias, *, stride=1, padding=0,
                     weight_mul=1.0, bias_mul=1.0):
    """x: (N, Cin, L)  weight: (Cout, Cin, K) -> (N, Cout, OL). Reuses the 2D path with H=1."""
    # conv1d padding applies only along L; pad here and call 2D path with padding=0.
    x_pad = jnp.pad(x, ((0, 0), (0, 0), (padding, padding)))
    x4 = x_pad[:, :, None, :]                  # (N, Cin, 1, Lp)
    w4 = weight[:, :, None, :]                 # (Cout, Cin, 1, K)
    out = equalized_conv2d(x4, w4, bias, stride=stride, padding=0,
                           weight_mul=weight_mul, bias_mul=bias_mul)
    return out[:, :, 0, :]


# ----------------------------------------------------------------------------
# Module parameters (mirrors EqualizedConv.__init__)
# ----------------------------------------------------------------------------
class EqualizedConvParams:
    """Deterministic re-implementation of EqualizedConv.__init__ parameter setup."""

    def __init__(self, key, in_channels, out_channels, kernel_size, dimension,
                 stride=1, padding=0, use_wscale=False, gain=math.sqrt(2), lr_mul=1.0):
        self.dimension = dimension
        self.stride = stride
        self.padding = padding
        he_std = gain * (in_channels * kernel_size ** 2) ** (-0.5)
        if use_wscale:
            init_std = 1.0 / lr_mul
            self.weight_mul = he_std * lr_mul
        else:
            init_std = he_std / lr_mul
            self.weight_mul = lr_mul
        self.bias_mul = lr_mul
        if dimension == 1:
            wshape = (out_channels, in_channels, kernel_size)
        else:
            wshape = (out_channels, in_channels, kernel_size, kernel_size)
        self.weight = jax.random.normal(key, wshape, dtype=jnp.float32) * init_std
        self.bias = jnp.zeros((out_channels,), jnp.float32)

    def __call__(self, x):
        if self.dimension == 1:
            return equalized_conv1d(x, self.weight, self.bias,
                                    stride=self.stride, padding=self.padding,
                                    weight_mul=self.weight_mul, bias_mul=self.bias_mul)
        return equalized_conv2d(x, self.weight, self.bias,
                                stride=self.stride, padding=self.padding,
                                weight_mul=self.weight_mul, bias_mul=self.bias_mul)


# ----------------------------------------------------------------------------
# References + self-test
# ----------------------------------------------------------------------------
def _ref_conv2d(x, weight, bias, stride, padding, weight_mul, bias_mul):
    out = jax.lax.conv_general_dilated(
        x, weight * weight_mul,
        window_strides=(stride, stride),
        padding=[(padding, padding), (padding, padding)],
        dimension_numbers=("NCHW", "OIHW", "NCHW"))
    return out + (bias * bias_mul)[None, :, None, None]


def _ref_conv1d(x, weight, bias, stride, padding, weight_mul, bias_mul):
    out = jax.lax.conv_general_dilated(
        x, weight * weight_mul,
        window_strides=(stride,),
        padding=[(padding, padding)],
        dimension_numbers=("NCH", "OIH", "NCH"))
    return out + (bias * bias_mul)[None, :, None]


if __name__ == "__main__":
    key = jax.random.PRNGKey(0)
    k_w, k_x = jax.random.split(key)

    # 1) dimension=2, small channels -> banded lane-packed kernel.
    #    EqualizedConv(4, 8, 3, dimension=2, padding=1, use_wscale=True)
    mod = EqualizedConvParams(k_w, in_channels=4, out_channels=8, kernel_size=3,
                              dimension=2, stride=1, padding=1, use_wscale=True)
    x = jax.random.normal(k_x, (2, 4, 16, 16), dtype=jnp.float32)
    out = jax.block_until_ready(mod(x))
    ref = _ref_conv2d(x, mod.weight, mod.bias, stride=1, padding=1,
                      weight_mul=mod.weight_mul, bias_mul=mod.bias_mul)
    assert out.shape == (2, 8, 16, 16)
    assert jnp.allclose(out, ref, atol=1e-4, rtol=1e-4)

    # 2) dimension=1 -> same banded kernel with H=1.
    #    EqualizedConv(4, 8, 3, dimension=1, padding=1)
    k_w1, k_x1 = jax.random.split(k_x)
    mod1 = EqualizedConvParams(k_w1, in_channels=4, out_channels=8, kernel_size=3,
                               dimension=1, stride=1, padding=1, use_wscale=False)
    x1 = jax.random.normal(k_x1, (2, 4, 16), dtype=jnp.float32)
    out1 = jax.block_until_ready(mod1(x1))
    ref1 = _ref_conv1d(x1, mod1.weight, mod1.bias, stride=1, padding=1,
                       weight_mul=mod1.weight_mul, bias_mul=mod1.bias_mul)
    assert out1.shape == (2, 8, 16)
    assert jnp.allclose(out1, ref1, atol=1e-4, rtol=1e-4)

    # 3) dimension=2, wide channels -> general row-tiled NHWC kernel
    #    (grid=(N, OH//TH), both axes parallel).
    k_w2, k_x2 = jax.random.split(k_x1)
    mod2 = EqualizedConvParams(k_w2, in_channels=32, out_channels=128, kernel_size=3,
                               dimension=2, stride=1, padding=1, use_wscale=True)
    x2 = jax.random.normal(k_x2, (2, 32, 16, 16), dtype=jnp.float32)
    out2 = jax.block_until_ready(mod2(x2))
    ref2 = _ref_conv2d(x2, mod2.weight, mod2.bias, stride=1, padding=1,
                       weight_mul=mod2.weight_mul, bias_mul=mod2.bias_mul)
    assert out2.shape == (2, 128, 16, 16)
    assert jnp.allclose(out2, ref2, atol=1e-4, rtol=1e-4)

    print("KERNEL_OK")
</pallas_src>

<mosaic_0001>
module attributes {stable_mosaic.version = 11 : i64} {
  func.func @_eq_conv_banded_kernel(%arg0: i32, %arg1: memref<1x18x72xf32, #tpu.memory_space<vmem>>, %arg2: memref<3x72x128xf32, #tpu.memory_space<vmem>>, %arg3: memref<1x128xf32, #tpu.memory_space<vmem>>, %arg4: memref<2xf32, #tpu.memory_space<smem>>, %arg5: memref<1x16x128xf32, #tpu.memory_space<vmem>>) attributes {dimension_semantics = [#tpu.dimension_semantics<parallel>], iteration_bounds = array<i64: 2>, scalar_prefetch = 0 : i64, scratch_operands = 0 : i64, tpu.core_type = #tpu.core_type<tc>, window_params = [{transform_indices = @transform_0, window_bounds = array<i64: 1, 18, 72>}, {pipeline_mode = #tpu.pipeline_mode<synchronous>, transform_indices = @transform_1, window_bounds = array<i64: 3, 72, 128>}, {pipeline_mode = #tpu.pipeline_mode<synchronous>, transform_indices = @transform_2, window_bounds = array<i64: 1, 128>}, {transform_indices = @transform_3, window_bounds = array<i64: 2>}, {transform_indices = @transform_4, window_bounds = array<i64: 1, 16, 128>}]} {
    %c0 = arith.constant 0 : index
    %c0_0 = arith.constant 0 : index
    %c0_1 = arith.constant 0 : index
    %0 = vector.load %arg1[%c0, %c0_0, %c0_1] : memref<1x18x72xf32, #tpu.memory_space<vmem>>, vector<1x18x72xf32>
    %1 = vector.shape_cast %0 : vector<1x18x72xf32> to vector<18x72xf32>
    %cst = arith.constant 0.000000e+00 : f32
    %2 = vector.broadcast %cst : f32 to vector<16x128xf32>
    %3 = vector.extract_strided_slice %1 {offsets = [0, 0], sizes = [16, 72], strides = [1, 1]} : vector<18x72xf32> to vector<16x72xf32>
    %c0_2 = arith.constant 0 : index
    %c0_3 = arith.constant 0 : index
    %c0_4 = arith.constant 0 : index
    %4 = vector.load %arg2[%c0_2, %c0_3, %c0_4] : memref<3x72x128xf32, #tpu.memory_space<vmem>>, vector<1x72x128xf32>
    %5 = vector.shape_cast %4 : vector<1x72x128xf32> to vector<72x128xf32>
    %cst_5 = arith.constant dense<0.000000e+00> : vector<16x128xf32>
    %6 = tpu.matmul %3, %5, %cst_5 {dimension_numbers = #tpu.dot_dimension_numbers<[1], [0], [0], [1], [0, 0, 1, 1], [], []>} : vector<16x72xf32>, vector<72x128xf32>, vector<16x128xf32> -> vector<16x128xf32>
    %7 = arith.addf %2, %6 : vector<16x128xf32>
    %8 = vector.extract_strided_slice %1 {offsets = [1, 0], sizes = [16, 72], strides = [1, 1]} : vector<18x72xf32> to vector<16x72xf32>
    %c1 = arith.constant 1 : index
    %c0_6 = arith.constant 0 : index
    %c0_7 = arith.constant 0 : index
    %9 = vector.load %arg2[%c1, %c0_6, %c0_7] : memref<3x72x128xf32, #tpu.memory_space<vmem>>, vector<1x72x128xf32>
    %10 = vector.shape_cast %9 : vector<1x72x128xf32> to vector<72x128xf32>
    %cst_8 = arith.constant dense<0.000000e+00> : vector<16x128xf32>
    %11 = tpu.matmul %8, %10, %cst_8 {dimension_numbers = #tpu.dot_dimension_numbers<[1], [0], [0], [1], [0, 0, 1, 1], [], []>} : vector<16x72xf32>, vector<72x128xf32>, vector<16x128xf32> -> vector<16x128xf32>
    %12 = arith.addf %7, %11 : vector<16x128xf32>
    %13 = vector.extract_strided_slice %1 {offsets = [2, 0], sizes = [16, 72], strides = [1, 1]} : vector<18x72xf32> to vector<16x72xf32>
    %c2 = arith.constant 2 : index
    %c0_9 = arith.constant 0 : index
    %c0_10 = arith.constant 0 : index
    %14 = vector.load %arg2[%c2, %c0_9, %c0_10] : memref<3x72x128xf32, #tpu.memory_space<vmem>>, vector<1x72x128xf32>
    %15 = vector.shape_cast %14 : vector<1x72x128xf32> to vector<72x128xf32>
    %cst_11 = arith.constant dense<0.000000e+00> : vector<16x128xf32>
    %16 = tpu.matmul %13, %15, %cst_11 {dimension_numbers = #tpu.dot_dimension_numbers<[1], [0], [0], [1], [0, 0, 1, 1], [], []>} : vector<16x72xf32>, vector<72x128xf32>, vector<16x128xf32> -> vector<16x128xf32>
    %17 = arith.addf %12, %16 : vector<16x128xf32>
    %c0_12 = arith.constant 0 : index
    %18 = memref.load %arg4[%c0_12] : memref<2xf32, #tpu.memory_space<smem>>
    %19 = vector.broadcast %18 : f32 to vector<16x128xf32>
    %20 = arith.mulf %17, %19 : vector<16x128xf32>
    %c0_13 = arith.constant 0 : index
    %c0_14 = arith.constant 0 : index
    %21 = vector.load %arg3[%c0_13, %c0_14] : memref<1x128xf32, #tpu.memory_space<vmem>>, vector<1x128xf32>
    %c1_15 = arith.constant 1 : index
    %22 = memref.load %arg4[%c1_15] : memref<2xf32, #tpu.memory_space<smem>>
    %23 = vector.broadcast %22 : f32 to vector<1x128xf32>
    %24 = arith.mulf %21, %23 : vector<1x128xf32>
    %25 = vector.broadcast %24 : vector<1x128xf32> to vector<16x128xf32>
    %26 = arith.addf %20, %25 : vector<16x128xf32>
    %c0_16 = arith.constant 0 : index
    %c0_17 = arith.constant 0 : index
    %c0_18 = arith.constant 0 : index
    %27 = vector.load %arg5[%c0_16, %c0_17, %c0_18] : memref<1x16x128xf32, #tpu.memory_space<vmem>>, vector<1x16x128xf32>
    %28 = vector.shape_cast %27 : vector<1x16x128xf32> to vector<16x128xf32>
    %29 = vector.shape_cast %26 : vector<16x128xf32> to vector<1x16x128xf32>
    tpu.vector_store %arg5[%c0_16, %c0_17, %c0_18], %29 {strides = array<i32>} : memref<1x16x128xf32, #tpu.memory_space<vmem>>, vector<1x16x128xf32>,
    return
  }
  func.func @transform_0(%arg0: i32) -> (i32, i32, i32) {
    %c0_i32 = arith.constant 0 : i32
    %c0_i32_0 = arith.constant 0 : i32
    %c0_i32_1 = arith.constant 0 : i32
    return %arg0, %c0_i32, %c0_i32_0 : i32, i32, i32
  }
  func.func @transform_1(%arg0: i32) -> (i32, i32, i32) {
    %c0_i32 = arith.constant 0 : i32
    %c0_i32_0 = arith.constant 0 : i32
    %c0_i32_1 = arith.constant 0 : i32
    %c0_i32_2 = arith.constant 0 : i32
    return %c0_i32, %c0_i32_0, %c0_i32_1 : i32, i32, i32
  }
  func.func @transform_2(%arg0: i32) -> (i32, i32) {
    %c0_i32 = arith.constant 0 : i32
    %c0_i32_0 = arith.constant 0 : i32
    %c0_i32_1 = arith.constant 0 : i32
    return %c0_i32, %c0_i32_0 : i32, i32
  }
  func.func @transform_3(%arg0: i32) -> i32 {
    %c0_i32 = arith.constant 0 : i32
    %c0_i32_0 = arith.constant 0 : i32
    return %c0_i32 : i32
  }
  func.func @transform_4(%arg0: i32) -> (i32, i32, i32) {
    %c0_i32 = arith.constant 0 : i32
    %c0_i32_0 = arith.constant 0 : i32
    %c0_i32_1 = arith.constant 0 : i32
    return %arg0, %c0_i32, %c0_i32_0 : i32, i32, i32
  }
}

</mosaic_0001>

<bundles_post_ra>
// kernel: tpu_custom_call.1
= control target key start
LH: loop header
LB: loop body
LE: loop exit
PB: predicated region body
PF: predicated region fallthrough
CT: control target
= control target key end

     0   :  { %9 = vsyncpa [#allocation3], 0  ;;  %s1122_s0 = inlined_call_operand.vmem [shape: f32[2,18,72], index: 0, kind: input, shape index: {}]   ;;  %s1123_s1 = inlined_call_operand.hbm [shape: f32[3,72,128], index: 1, kind: input, shape index: {}]   ;;  %s1124_s2 = inlined_call_operand.vmem [shape: f32[1,128], index: 2, kind: input, shape index: {}]   ;;  %s1125_s3 = inlined_call_operand.vmem [shape: f32[2], index: 3, kind: input, shape index: {}]   ;;  %s1126_s4 = inlined_call_operand.hbm [shape: f32[2,16,128], index: 4, kind: output, shape index: {}]  }
   0x1   :  { %10 = vsyncpa [#allocation5], 0 }
   0x2   :  { %11 = vsyncpa [#allocation4], 0 }
   0x3   :  { %13 = vsyncpa [#allocation4 + $0x1], 0  ;;  %s957_s15 = smov 0   ;;  %s959_s16 = smov 0  }
   0x4   :  { %s961_s17 = smov 0   ;;  %s963_s18 = smov 0  }
   0x5 LB: > { %s978_s19 = sadd.s32 4294967295, %s923_s18   ;;  %s630_s20 = sadd.s32 4294967294, %s923_s18   ;;  %s923_s18 = sphi %s963_s18, %s1140_s18   ;;  %s919_s17 = sphi %s961_s17, %s1139_s17   ;;  %s915_s16 = sphi %s959_s16, %s1138_s16   ;;  %s911_s15 = sphi %s957_s15, %s1137_s15  }
   0x6   : > { %s982_s21 = sadd.s32 1, %s923_s18   ;;  %s115_s22 = sadd.s32 1, %s919_s17 }
   0x7   : > { %s112_s23 = ssub.s32 %s923_s18, %s982_s21  ;;  %p125_p0 = scmp.ne.s32.totalorder %s919_s17, %s915_s16 }
   0x8   : > { %p113_p1 = scmp.eq.s32.totalorder %s112_s23, 0  ;;  %p126_p2 = scmp.eq.s32.totalorder %s978_s19, 1 }
   0x9   : > { %p131_p3 = scmp.ne.s32.totalorder %s915_s16, %s911_s15  ;;  %p132_p4 = scmp.eq.s32.totalorder %s630_s20, 1 }
   0xa   : > { %s993_s24 = scalar_select %p113_p1, %s919_s17, %s115_s22  }
   0xb   : > { %p995_p5 = por %p126_p2, %p125_p0  ;;  %p999_p6 = por %p132_p4, %p131_p3 }
   0xc   : > { %p631_p7 = scmp.ge.s32.totalorder %s923_s18, 1  ;;  %p139_p8 = scmp.lt.s32.totalorder %s923_s18, 3 }
   0xd   : > { %s1129_s26 = scalar_select %p999_p6, 1, 0 }
   0xe   : > { %p1127_p9 = scmp.eq.s32.totalorder %s978_s19, 0  ;;  %p1006_p10 = pnand %p631_p7, %p139_p8 }
   0xf   : > { %s925_s28 = smov [#allocation2]   ;;  %s168_s6 = sshll.u32 %s1125_s3, 4  ;;  %s169_s6 = int_to_ptr.vmem [resolvable:$true] %s168_s6 }
  0x10   : > { %s151_s29 = sshll.u32 %s925_s28, 4  ;;  %p760_p11 = pneg %p1006_p10  ;;  %s152_s29 = int_to_ptr.vmem [resolvable:$true] %s151_s29 }
  0x11   : > { %s825_s8 = scalar_lea.vmem %s152_s29, 3456  ;;  %p833_p3 = scmp.lt.s32.totalorder %s152_s29, %s152_s29 }
  0x12   : > { %p1017_p12 = pnand %p1127_p9, %p760_p11  ;;  %p826_p0 = scmp.ne.s32.totalorder %s152_s29, %s825_s8 }
  0x13   : > { %p834_p4 = scmp.lt.s32.totalorder %s825_s8, %s825_s8 }
  0x14   : > { %p816_p13 = pneg %p1017_p12 }
  0x15   : > { %p835_p7 = por %p834_p4, %p833_p3 }
  0x16   : > { %p828_p1 = pnand %p826_p0, %p816_p13 }
  0x18   : > { %p829_p2 = pneg %p828_p1 }
  0x1a   : > { %p836_p8 = pnand %p835_p7, %p829_p2 }
  0x1c   : > { %839 = shalt.err (!%p836_p8)
}
  0x1d   : > { %s926_s9 = smov 128   ;;  %s927_s10 = smov 8  }
  0x1e   : > { %763 = dma.hbm_to_vmem [thread:$0]  (!%p1017_p12), %s1123_s1, 3456, %s152_s29, [#allocation3], %s926_s9, %s926_s9, %s927_s10  }
  0x1f   : > { %s840_s13 = scalar_lea.vmem %s169_s6, 16  ;;  %p848_p9 = scmp.lt.s32.totalorder %s169_s6, %s169_s6 }
  0x20   : > { %p841_p11 = scmp.ne.s32.totalorder %s169_s6, %s840_s13  ;;  %p849_p6 = scmp.lt.s32.totalorder %s840_s13, %s840_s13 }
  0x22   : > { %p843_p0 = pnand %p841_p11, %p816_p13  ;;  %p850_p3 = por %p849_p6, %p848_p9 }
  0x24   : > { %p844_p1 = pneg %p843_p0 }
  0x26   : > { %p851_p2 = pnand %p850_p3, %p844_p1 }
  0x28   : > { %854 = shalt.err (!%p851_p2)
}
  0x29   : > { %s928_s14 = smov [#allocation6]   ;;  %189 = sbr.rel (%p1006_p10) target bundleno = 307 (0x133), region = 36 }
  0x2a   : > { %766 = dma.vmem_to_smem (!%p1017_p12), %s169_s6, 16, %s928_s14, [#allocation5]  }
  0x2b   : > { %p1132_p4 = scmp.eq.s32.totalorder (!%p1006_p10), %s978_s19, 0 }
  0x2e   : > { %898 = dma.done.wait (%p1132_p4), [#allocation3], 3456   ;;  %p1133_p7 = pmov %p1132_p4 }
  0x2f   : > { %p1134_p13 = pmov %p1132_p4 }
  0x30   : > { %900 = vsyncadd (%p1133_p7), [#allocation3], 4294963840 }
  0x31   : > { %902 = dma.done.wait (%p1134_p13), [#allocation5], 16   ;;  %p1135_p6 = pmov %p1132_p4 }
  0x33   : > { %904 = vsyncadd (%p1135_p6), [#allocation5], 4294967280 }
  0x34   : > { %199 = sfence }
  0x35   : > { %v246_v0 = vld [vmem:[#allocation2 + $0x88] sm:$0xff]  ;;  %v236_v1 = vld [vmem:[#allocation2 + $0x40] sm:$0xff]  ;;  %p220_p9 = scmp.lt.s32.totalorder %s978_s19, 1  ;;  %v235_v3 = vld [vmem:[#allocation2 + $0x38] sm:$0xff]  ;;  %vm250_vm0 = vcmask 1046528   ;;  %vm256_vm1 = vcmask 588800   ;;  %v521_v40 = vlaneseq }
  0x36   : > { %v245_v2 = vld [vmem:[#allocation2 + $0x80] sm:$0xff]  ;;  %686 = vmatprep.subr.mxu0 %v246_v0  ;;  %707 = vmatprep.subr.mxu1 %v236_v1  ;;  %v244_v4 = vld [vmem:[#allocation2 + $0x78] sm:$0xff]  ;;  %v234_v5 = vld [vmem:[#allocation2 + $0x30] sm:$0xff]  ;;  %vm425_vm2 = vcmask 1045504   ;;  %s646_s29 = sld [smem:[#allocation6 + $0x1]]  ;;  %s217_s5 = sand.u32 1, %s915_s16  }
  0x37   : > { %687 = vmatpush3.msra.mxu0 %v246_v0  ;;  %708 = vmatpush3.msra.mxu1 %v236_v1  ;;  %s221_s20 = scalar_select %p220_p9, %s978_s19, 1  ;;  %v243_v6 = vld [vmem:[#allocation2 + $0x70] sm:$0xff]  ;;  %v233_v7 = vld [vmem:[#allocation2 + $0x28] sm:$0xff]  ;;  %v232_v9 = vld [vmem:[#allocation2 + $0x20] sm:$0xff]  ;;  %v522_v41 = vshrl.u32 %v521_v40, 7 }
  0x38   : > { %688 = vmatprep.subr.mxu0 %v245_v2  ;;  %709 = vmatprep.subr.mxu1 %v235_v3  ;;  %v242_v8 = vld [vmem:[#allocation2 + $0x68] sm:$0xff]  ;;  %v241_v10 = vld [vmem:[#allocation2 + $0x60] sm:$0xff]  ;;  %v231_v11 = vld [vmem:[#allocation2 + $0x18] sm:$0xff]  ;;  %s512_s30 = sld [smem:[#allocation6]]  ;;  %s638_s8 = sshll.u32 %s217_s5, 4 }
  0x39   : > { %689 = vmatpush3.msra.mxu0 %v245_v2  ;;  %710 = vmatpush3.msra.mxu1 %v235_v3  ;;  %s749_s22 = smul.u32 24, %s221_s20  ;;  %v240_v14 = vld [vmem:[#allocation2 + $0x58] sm:$0xff]  ;;  %v230_v15 = vld [vmem:[#allocation2 + $0x10] sm:$0xff]  ;;  %v229_v20 = vld [vmem:[#allocation2 + $0x8] sm:$0xff]  ;;  %v523_v47 = vsub.s32 0, %v522_v41  ;;  %s219_s9 = scalar_lea.vmem [#allocation7], %s638_s8 }
  0x3a   : > { %690 = vmatprep.subr.mxu0 %v244_v4  ;;  %711 = vmatprep.subr.mxu1 %v234_v5  ;;  %v239_v19 = vld [vmem:[#allocation2 + $0x50] sm:$0xff]  ;;  %v238_v22 = vld [vmem:[#allocation2 + $0x48] sm:$0xff]  ;;  %v228_v23 = vld [vmem:[#allocation2] sm:$0xff]  ;;  %s544_s10 = sshll.u32 %s219_s9, 4  ;;  %s652_s11 = sshll.u32 %s978_s19, 8  ;;  %s1075_s10 = int_to_ptr.vmem [resolvable:$true] %s544_s10 }
  0x3b   : > { %691 = vmatpush3.msra.mxu0 %v244_v4  ;;  %712 = vmatpush3.msra.mxu1 %v234_v5  ;;  %s224_s28 = scalar_lea.vmem %s1122_s0, %s749_s22  ;;  %v424_v28 = vld [vmem:[#allocation2 + $0xd0] sm:$0xff]  ;;  %v423_v30 = vld [vmem:[#allocation2 + $0xc8] sm:$0xff]  ;;  %v422_v31 = vld [vmem:[#allocation2 + $0xc0] sm:$0xff]  ;;  %s1080_s14 = scalar_lea.hbm %s1126_s4, %s652_s11 }
  0x3c   : > { %692 = vmatprep.subr.mxu0 %v243_v6  ;;  %713 = vmatprep.subr.mxu1 %v233_v7  ;;  %v225_v12 = vld [vmem:[%s224_s28] sm:$0xff]  ;;  %v1051_v13 = vld [vmem:[%s224_s28 + $0x8] sm:$0xff]  ;;  %v1053_v16 = vld [vmem:[%s224_s28 + $0x10] sm:$0x3]  ;;  %v518_v45 = vstv %s646_s29  ;;  %s1082_s20 = scalar_lea.sflag [#allocation4], %s217_s5  ;;  %s855_s22 = scalar_lea.vmem %s1075_s10, 256 }
  0x3d   : > { %693 = vmatpush3.msra.mxu0 %v243_v6  ;;  %714 = vmatpush3.msra.mxu1 %v233_v7  ;;  %v251_v17 = vrot.slane %v225_v12, 1  ;;  %v252_v18 = vrot.slane %v1051_v13, 1  ;;  %v254_v21 = vrot.slane %v1053_v16, 1  ;;  %v426_v24 = vrot.slane %v225_v12, 2  ;;  %v421_v32 = vld [vmem:[#allocation2 + $0xb8] sm:$0xff]  ;;  %v420_v33 = vld [vmem:[#allocation2 + $0xb0] sm:$0xff]  ;;  %p856_p10 = scmp.ne.s32.totalorder %s1075_s10, %s855_s22 }
  0x3e   : > { %694 = vmatprep.subr.mxu0 %v242_v8  ;;  %715 = vmatprep.subr.mxu1 %v232_v9  ;;  %v427_v25 = vrot.slane %v1051_v13, 2  ;;  %v419_v34 = vld [vmem:[#allocation2 + $0xa8] sm:$0xff]  ;;  %v418_v35 = vld [vmem:[#allocation2 + $0xa0] sm:$0xff]  ;;  %v429_v36 = vrot.slane %v1053_v16, 2  ;;  %v417_v37 = vld [vmem:[#allocation2 + $0x98] sm:$0xff]  ;;  %v513_v52 = vstv %s512_s30  ;;  %s929_s19 = smov [#allocation7]  }
  0x3f   : > { %695 = vmatpush3.msra.mxu0 %v242_v8  ;;  %716 = vmatpush3.msra.mxu1 %v232_v9  ;;  %v253_v26 = vsel %vm250_vm0, %v251_v17, %v252_v18  ;;  %v255_v27 = vsel %vm250_vm0, %v252_v18, %v254_v21  ;;  %v416_v38 = vld [vmem:[#allocation2 + $0x90] sm:$0xff]  ;;  %v516_v44 = vld [vmem:[%s1124_s2] sm:$0x1]  ;;  %p857_p12 = pnand %p856_p10, %p995_p5  ;;  %s859_s23 = sshll.u32 %s929_s19, 4  ;;  %s860_s23 = int_to_ptr.vmem [resolvable:$false] %s859_s23 }
  0x40   : > { %696 = vmatprep.subr.mxu0 %v241_v10  ;;  %717 = vmatprep.subr.mxu1 %v231_v11  ;;  %v428_v29 = vsel %vm425_vm2, %v426_v24, %v427_v25  ;;  %v430_v39 = vsel %vm425_vm2, %v427_v25, %v429_v36  ;;  %v519_v46 = vmul.f32 %v518_v45, %v516_v44  ;;  %s861_s27 = scalar_lea.vmem %s860_s23, 512  ;;  %p862_p11 = scmp.lt.s32.totalorder %s1075_s10, %s860_s23 }
  0x41   : > { %697 = vmatpush3.msra.mxu0 %v241_v10  ;;  %718 = vmatpush3.msra.mxu1 %v231_v11  ;;  %p858_p8 = pneg %p857_p12  ;;  %p863_p0 = scmp.lt.s32.totalorder %s861_s27, %s855_s22 }
  0x42   : > { %698 = vmatprep.subr.mxu0 %v240_v14  ;;  %719 = vmatprep.subr.mxu1 %v230_v15  ;;  %v524_v55 = vrot.slane %v519_v46, %v523_v47 }
  0x43   : > { %699 = vmatpush3.msra.mxu0 %v240_v14  ;;  %720 = vmatpush3.msra.mxu1 %v230_v15  ;;  %p864_p1 = por %p863_p0, %p862_p11 }
  0x44   : > { %700 = vmatprep.subr.mxu0 %v239_v19  ;;  %721 = vmatprep.subr.mxu1 %v229_v20 }
  0x45   : > { %701 = vmatpush3.msra.mxu0 %v239_v19  ;;  %722 = vmatpush3.msra.mxu1 %v229_v20  ;;  %p865_p3 = pnand %p864_p1, %p858_p8 }
  0x46   : > { %702 = vmatprep.subr.mxu0 %v238_v22  ;;  %723 = vmatprep.subr.mxu1 %v228_v23 }
  0x47   : > { %703 = vmatpush3.msra.mxu0 %v238_v22  ;;  %704 = vmatprep.mubr.msk.f32.mxu0 %vm256_vm1, %v253_v26 }
  0x48   : > { %724 = vmatpush3.msra.mxu1 %v228_v23  ;;  %725 = vmatprep.mubr.msk.f32.mxu1 %vm256_vm1, %v225_v12 }
  0x49   : > { %705 = vmatmul.mubr.msk.f32.vlgmr.msra.gmra.mxu0 %vm256_vm1, %v255_v27  ;;  %726 = vmatmul.mubr.msk.f32.vlgmr.msra.gmra.mxu1 %vm256_vm1, %v1051_v13 }
  0x4a   : > { %728 = vmatprep.subr.mxu0 %v424_v28  ;;  %746 = vmatprep.mubr.msk.f32.mxu0 %vm256_vm1, %v428_v29 }
  0x4b   : > { %729 = vmatpush3.msra.mxu0 %v424_v28 }
  0x4c   : > { %730 = vmatprep.subr.mxu0 %v423_v30 }
  0x4d   : > { %731 = vmatpush3.msra.mxu0 %v423_v30 }
  0x4e   : > { %732 = vmatprep.subr.mxu0 %v422_v31 }
  0x4f   : > { %733 = vmatpush3.msra.mxu0 %v422_v31 }
  0x50   : > { %734 = vmatprep.subr.mxu0 %v421_v32 }
  0x51   : > { %735 = vmatpush3.msra.mxu0 %v421_v32 }
  0x52   : > { %736 = vmatprep.subr.mxu0 %v420_v33 }
  0x53   : > { %737 = vmatpush3.msra.mxu0 %v420_v33 }
  0x54   : > { %738 = vmatprep.subr.mxu0 %v419_v34 }
  0x55   : > { %739 = vmatpush3.msra.mxu0 %v419_v34 }
  0x56   : > { %740 = vmatprep.subr.mxu0 %v418_v35 }
  0x57   : > { %741 = vmatpush3.msra.mxu0 %v418_v35 }
  0x58   : > { %742 = vmatprep.subr.mxu0 %v417_v37 }
  0x59   : > { %743 = vmatpush3.msra.mxu0 %v417_v37 }
  0x5a   : > { %744 = vmatprep.subr.mxu0 %v416_v38 }
  0x5b   : > { %745 = vmatpush3.msra.mxu0 %v416_v38 }
  0x5c   : > { %747 = vmatmul.mubr.msk.f32.vlgmr.msra.gmra.mxu0 %vm256_vm1, %v430_v39 }
 0x109   : > { %v706_v42 = vpop.f32.mrf.mxu0  ;;  %v727_v43 = vpop.f32.mrf.mxu1 }
 0x10a   : > { %v412_v50 = vadd.f32 %v727_v43, %v706_v42 }
 0x10b   : > { %v327_v48 = vpop.f32.mrf.mxu0  ;;  %v406_v49 = vpop.f32.mrf.mxu1 }
 0x10c   : > { %v407_v53 = vadd.f32 %v406_v49, %v327_v48 }
 0x11c   : > { %v748_v51 = vpop.f32.mrf.mxu0 }
 0x11d   : > { %v511_v54 = vadd.f32 %v748_v51, %v412_v50 }
 0x11e   : > { %v501_v56 = vpop.f32.mrf.mxu0 }
 0x11f   : > { %v515_v57 = vmul.f32 %v513_v52, %v511_v54  ;;  %v510_v58 = vadd.f32 %v501_v56, %v407_v53 }
 0x121   : > { %v527_v59 = vadd.f32 %v524_v55, %v515_v57  ;;  %v514_v60 = vmul.f32 %v513_v52, %v510_v58 }
 0x123   : > { %529 = vst [vmem:[%s219_s9 + $0x8] sm:$0xff] %v527_v59  ;;  %v526_v61 = vadd.f32 %v524_v55, %v514_v60 }
 0x125   : > { %528 = vst [vmem:[%s219_s9] sm:$0xff] %v526_v61 }
 0x126   : > { %868 = shalt.err (!%p865_p3)
}
 0x127   : > { %s869_s28 = scalar_lea.hbm %s1080_s14, 256  ;;  %s873_s5 = scalar_lea.hbm %s1126_s4, 512 }
 0x128   : > { %p870_p2 = scmp.ne.s32.totalorder %s1080_s14, %s869_s28  ;;  %p874_p13 = scmp.lt.s32.totalorder %s1080_s14, %s1126_s4 }
 0x129   : > { %p875_p6 = scmp.lt.s32.totalorder %s873_s5, %s869_s28 }
 0x12a   : > { %p871_p4 = pnand %p870_p2, %p995_p5 }
 0x12b   : > { %p876_p9 = por %p875_p6, %p874_p13 }
 0x12c   : > { %p872_p7 = pneg %p871_p4 }
 0x12e   : > { %p877_p10 = pnand %p876_p9, %p872_p7 }
 0x130   : > { %880 = shalt.err (!%p877_p10)
}
 0x131   : > { %s930_s8 = smov 128   ;;  %s931_s9 = smov 8  }
 0x132   : > { %758 = dma.vmem_to_hbm [thread:$0]  (%p995_p5), %s1075_s10, 256, %s1080_s14, %s1082_s20, %s930_s8, %s930_s8, %s931_s9  }
 0x133 PF: > { %p775_p12 = scmp.ge.s32.totalorder %s923_s18, 2  ;;  %s559_s11 = sand.u32 1, %s911_s15  }
 0x134   : > { %p1136_p8 = scmp.ne.s32.totalorder %s1129_s26, 0  ;;  %s560_s12 = scalar_lea.sflag [#allocation4], %s559_s11 }
 0x136   : > { %p768_p11 = pnand %p775_p12, %p1136_p8 }
 0x138   : > { %p769_p0 = pneg %p768_p11 }
 0x13a   : > { %906 = dma.done.wait (%p769_p0), %s560_s12, 256  }
 0x13b   : > { %908 = vsyncadd (%p769_p0), %s560_s12, 4294967040  ;;  %p16_p1 = scmp.ge.s32.totalorder %s982_s21, 4   ;;  %s1137_s15 = smov %s915_s16 }
 0x13c   : > { %s1138_s16 = smov %s919_s17  ;;  %s1139_s17 = smov %s993_s24 }
 0x13d   : > { %s1140_s18 = smov %s982_s21  ;;  %18 = sbr.rel (!%p16_p1) target bundleno = 5 (0x5), region = 83 }
 0x142   :  { %565 = vsyncpa [#allocation3], 1 }
 0x143   :  { %567 = vsyncpa [#allocation3 + $0x1], 1 }
 0x144   :  { %568 = vsyncpa [#allocation4], 1 }
 0x145   :  { %570 = vsyncpa [#allocation4 + $0x1], 1 }
 0x146   :  { %571 = vsyncpa [#allocation5], 1 }
 0x147   :  { %573 = vsyncpa [#allocation5 + $0x1], 1 }

</bundles_post_ra>
